<compile_context>
chip_gen: v5e
topology: v5e:2x2
jax: 0.10.0
libtpu: 0.0.40
codegen_flags: <defaults>
</compile_context>

<pallas_src>
import functools

import jax
import jax.numpy as jnp
from jax import lax
from jax.experimental import pallas as pl
from jax.experimental.pallas import tpu as pltpu


def _default_compute_dtype():
    """bf16 on VPU generations that support it (v6e / v7x), f32 otherwise."""
    try:
        kind = jax.devices()[0].device_kind.lower()
    except Exception:  # pragma: no cover - defensive
        return jnp.float32
    if any(tag in kind for tag in ("v6", "v7", "7x", "trillium")):
        return jnp.bfloat16
    return jnp.float32


def _mlpdec_kernel(x_ref, w1_ref, b1_ref, w2_ref, b2_ref, o_ref, *,
                   chunk, num_chunks, compute_dtype, unroll):
    # x_ref:  (C_in, TL)   -- L on lanes (lane-dense), TL = num_chunks * chunk
    # w1_ref: (H, C_in)    b1_ref: (H, 1)
    # w2_ref: (C_out, H)   b2_ref: (C_out, 1)
    # o_ref:  (C_out, TL)
    cdt = compute_dtype
    w1 = w1_ref[...]          # already in compute dtype (cast in the wrapper)
    b1 = b1_ref[...]
    w2 = w2_ref[...]
    b2 = b2_ref[...]
    h_dim, c_in = w1.shape
    c_out = w2.shape[0]

    # Pre-splat each weight column along the lane axis ONCE per grid step so the
    # inner chunk loop is (mostly) pure mul+add on the VALU.  These are small
    # ((H|C_out, chunk)) and loop-invariant.
    w1_cols = [jnp.broadcast_to(w1[:, c:c + 1], (h_dim, chunk)) for c in range(c_in)]
    w2_cols = [jnp.broadcast_to(w2[:, j:j + 1], (c_out, chunk)) for j in range(h_dim)]

    def _compute(x):
        # x: (C_in, chunk) in compute dtype.
        # fc1: unrolled rank-1 taps over the C_in channels; bias folded into the
        # ReLU input (no broadcast_to accumulator init).
        h = w1_cols[0] * x[0:1, :]
        for c in range(1, c_in):
            h = h + w1_cols[c] * x[c:c + 1, :]
        h = jnp.maximum(h + b1, 0)
        # fc2: unrolled over the H taps; bias folded into the final add.
        y = w2_cols[0] * h[0:1, :]
        for j in range(1, h_dim):
            y = y + w2_cols[j] * h[j:j + 1, :]
        return y + b2

    if num_chunks == 1:
        o_ref[...] = _compute(x_ref[...].astype(cdt)).astype(o_ref.dtype)
    else:
        def body(i, carry):
            off = pl.multiple_of(i * chunk, chunk)
            x = x_ref[:, pl.ds(off, chunk)].astype(cdt)
            o_ref[:, pl.ds(off, chunk)] = _compute(x).astype(o_ref.dtype)
            return carry

        lax.fori_loop(0, num_chunks, body, None, unroll=unroll)


def mlp_dec_forward(x, mask, w1, b1, w2, b2, *,
                    tile_l=32768, chunk_l=512, compute_dtype=None, unroll=4):
    """MLPDec forward.  x: (B, C_in, L).  mask is ignored (matches PyTorch forward).

    w1: (2*C_in, C_in)  (PyTorch Conv1d weight squeezed), b1: (2*C_in,)
    w2: (C_out, 2*C_in),                                   b2: (C_out,)
    Returns (B, C_out, L) in x.dtype.
    """
    del mask  # unused by MLPDec.forward
    B, C_in, L = x.shape
    H = w1.shape[0]
    C_out = w2.shape[0]
    assert w1.shape == (H, C_in) and w2.shape == (C_out, H)
    assert b1.shape == (H,) and b2.shape == (C_out,)
    assert chunk_l % 128 == 0, "chunk_l must be a multiple of 128 (lane width)"
    assert tile_l % chunk_l == 0, "tile_l must be a multiple of chunk_l"

    if compute_dtype is None:
        compute_dtype = _default_compute_dtype()

    # ---- choose the L tile (no host-side padding; grid uses cdiv) -------------
    if L <= chunk_l:
        TL, grid_l = L, 1                 # full-L block (allowed for small L)
        chunk, num_chunks = L, 1
    else:
        TL = min(tile_l, pl.cdiv(L, chunk_l) * chunk_l)
        grid_l = pl.cdiv(L, TL)
        # Keep >= 2 parallel grid steps so both v7x TensorCores get work.
        if B * grid_l < 2 and TL > chunk_l:
            TL = max(chunk_l, pl.cdiv(TL, 2 * chunk_l) * chunk_l)
            grid_l = pl.cdiv(L, TL)
        chunk = chunk_l
        num_chunks = TL // chunk_l

    loop_unroll = max(1, min(int(unroll), num_chunks))

    cdt = compute_dtype
    w1c = w1.astype(cdt)
    w2c = w2.astype(cdt)
    b1c = b1.reshape(H, 1).astype(cdt)
    b2c = b2.reshape(C_out, 1).astype(cdt)

    kernel = functools.partial(
        _mlpdec_kernel, chunk=chunk, num_chunks=num_chunks,
        compute_dtype=cdt, unroll=loop_unroll)

    return pl.pallas_call(
        kernel,
        out_shape=jax.ShapeDtypeStruct((B, C_out, L), x.dtype),
        grid_spec=pltpu.PrefetchScalarGridSpec(
            num_scalar_prefetch=0,
            grid=(B, grid_l),
            in_specs=[
                # Batch dim squeezed out; L on lanes (lane-dense loads/stores).
                pl.BlockSpec((None, C_in, TL), lambda b, l: (b, 0, l)),
                pl.BlockSpec((H, C_in), lambda b, l: (0, 0)),
                pl.BlockSpec((H, 1), lambda b, l: (0, 0)),
                pl.BlockSpec((C_out, H), lambda b, l: (0, 0)),
                pl.BlockSpec((C_out, 1), lambda b, l: (0, 0)),
            ],
            out_specs=pl.BlockSpec((None, C_out, TL), lambda b, l: (b, 0, l)),
        ),
        compiler_params=pltpu.CompilerParams(
            dimension_semantics=("parallel", "parallel")),
    )(x, w1c, b1c, w2c, b2c)


def _reference(x, w1, b1, w2, b2):
    h = jnp.maximum(jnp.einsum("bcl,hc->bhl", x, w1) + b1[None, :, None], 0.0)
    return jnp.einsum("bhl,oh->bol", h, w2) + b2[None, :, None]


if __name__ == "__main__":
    # Small, deterministic example consistent with MLPDec(in_size=4, out_size=4).
    B, C_in, L = 2, 4, 16
    C_out = 4
    H = C_in * 2

    key = jax.random.PRNGKey(0)
    kx, km, kw1, kb1, kw2, kb2 = jax.random.split(key, 6)

    x = jax.random.normal(kx, (B, C_in, L), dtype=jnp.float32)
    mask = jax.random.bernoulli(km, 0.5, (B, 1, L)).astype(jnp.float32)  # unused

    # Deterministic parameters (shapes match nn.Conv1d(in, out, 1) squeezed).
    w1 = jax.random.normal(kw1, (H, C_in), dtype=jnp.float32) * 0.1
    b1 = jax.random.normal(kb1, (H,), dtype=jnp.float32) * 0.1
    w2 = jax.random.normal(kw2, (C_out, H), dtype=jnp.float32) * 0.1
    b2 = jax.random.normal(kb2, (C_out,), dtype=jnp.float32) * 0.1

    # 1) Tiny-L path, strict f32 check.
    y = mlp_dec_forward(x, mask, w1, b1, w2, b2, compute_dtype=jnp.float32)
    jax.block_until_ready(y)
    assert y.shape == (B, C_out, L)
    assert jnp.allclose(y, _reference(x, w1, b1, w2, b2), atol=1e-5, rtol=1e-5)

    # 2) Ragged L handled in-kernel (single partial block, no host pad/slice).
    L2 = 1000
    x2 = jax.random.normal(jax.random.PRNGKey(1), (B, C_in, L2), dtype=jnp.float32)
    y2 = mlp_dec_forward(x2, None, w1, b1, w2, b2, compute_dtype=jnp.float32)
    jax.block_until_ready(y2)
    assert y2.shape == (B, C_out, L2)
    assert jnp.allclose(y2, _reference(x2, w1, b1, w2, b2), atol=1e-5, rtol=1e-5)

    # 3) Long L: multiple 32K-lane tiles + ragged last tile, with the
    #    generation-dependent default compute dtype (bf16 on v6e/v7x, f32 on v5e).
    L3 = 70000
    x3 = jax.random.normal(jax.random.PRNGKey(2), (B, C_in, L3), dtype=jnp.float32)
    y3 = mlp_dec_forward(x3, None, w1, b1, w2, b2)
    jax.block_until_ready(y3)
    assert y3.shape == (B, C_out, L3)
    assert jnp.allclose(y3, _reference(x3, w1, b1, w2, b2), atol=3e-2, rtol=3e-2)

    print("KERNEL_OK")
</pallas_src>

<mosaic_0001>
module attributes {stable_mosaic.version = 11 : i64} {
  func.func @_mlpdec_kernel(%arg0: i32, %arg1: i32, %arg2: memref<1x4x16xf32, #tpu.memory_space<vmem>>, %arg3: memref<8x4xf32, #tpu.memory_space<vmem>>, %arg4: memref<8x1xf32, #tpu.memory_space<vmem>>, %arg5: memref<4x8xf32, #tpu.memory_space<vmem>>, %arg6: memref<4x1xf32, #tpu.memory_space<vmem>>, %arg7: memref<1x4x16xf32, #tpu.memory_space<vmem>>) attributes {dimension_semantics = [#tpu.dimension_semantics<parallel>, #tpu.dimension_semantics<parallel>], iteration_bounds = array<i64: 2, 1>, scalar_prefetch = 0 : i64, scratch_operands = 0 : i64, tpu.core_type = #tpu.core_type<tc>, window_params = [{transform_indices = @transform_0, window_bounds = array<i64: 1, 4, 16>}, {pipeline_mode = #tpu.pipeline_mode<synchronous>, transform_indices = @transform_1, window_bounds = array<i64: 8, 4>}, {pipeline_mode = #tpu.pipeline_mode<synchronous>, transform_indices = @transform_2, window_bounds = array<i64: 8, 1>}, {pipeline_mode = #tpu.pipeline_mode<synchronous>, transform_indices = @transform_3, window_bounds = array<i64: 4, 8>}, {pipeline_mode = #tpu.pipeline_mode<synchronous>, transform_indices = @transform_4, window_bounds = array<i64: 4, 1>}, {transform_indices = @transform_5, window_bounds = array<i64: 1, 4, 16>}]} {
    %c0 = arith.constant 0 : index
    %c0_0 = arith.constant 0 : index
    %0 = vector.load %arg3[%c0, %c0_0] : memref<8x4xf32, #tpu.memory_space<vmem>>, vector<8x4xf32>
    %c0_1 = arith.constant 0 : index
    %c0_2 = arith.constant 0 : index
    %1 = vector.load %arg4[%c0_1, %c0_2] : memref<8x1xf32, #tpu.memory_space<vmem>>, vector<8x1xf32>
    %c0_3 = arith.constant 0 : index
    %c0_4 = arith.constant 0 : index
    %2 = vector.load %arg5[%c0_3, %c0_4] : memref<4x8xf32, #tpu.memory_space<vmem>>, vector<4x8xf32>
    %c0_5 = arith.constant 0 : index
    %c0_6 = arith.constant 0 : index
    %3 = vector.load %arg6[%c0_5, %c0_6] : memref<4x1xf32, #tpu.memory_space<vmem>>, vector<4x1xf32>
    %4 = vector.extract_strided_slice %0 {offsets = [0, 0], sizes = [8, 1], strides = [1, 1]} : vector<8x4xf32> to vector<8x1xf32>
    %5 = vector.shape_cast %4 : vector<8x1xf32> to vector<8x1xf32>
    %6 = vector.broadcast %5 : vector<8x1xf32> to vector<8x16xf32>
    %7 = vector.extract_strided_slice %0 {offsets = [0, 1], sizes = [8, 1], strides = [1, 1]} : vector<8x4xf32> to vector<8x1xf32>
    %8 = vector.shape_cast %7 : vector<8x1xf32> to vector<8x1xf32>
    %9 = vector.broadcast %8 : vector<8x1xf32> to vector<8x16xf32>
    %10 = vector.extract_strided_slice %0 {offsets = [0, 2], sizes = [8, 1], strides = [1, 1]} : vector<8x4xf32> to vector<8x1xf32>
    %11 = vector.shape_cast %10 : vector<8x1xf32> to vector<8x1xf32>
    %12 = vector.broadcast %11 : vector<8x1xf32> to vector<8x16xf32>
    %13 = vector.extract_strided_slice %0 {offsets = [0, 3], sizes = [8, 1], strides = [1, 1]} : vector<8x4xf32> to vector<8x1xf32>
    %14 = vector.shape_cast %13 : vector<8x1xf32> to vector<8x1xf32>
    %15 = vector.broadcast %14 : vector<8x1xf32> to vector<8x16xf32>
    %16 = vector.extract_strided_slice %2 {offsets = [0, 0], sizes = [4, 1], strides = [1, 1]} : vector<4x8xf32> to vector<4x1xf32>
    %17 = vector.shape_cast %16 : vector<4x1xf32> to vector<4x1xf32>
    %18 = vector.broadcast %17 : vector<4x1xf32> to vector<4x16xf32>
    %19 = vector.extract_strided_slice %2 {offsets = [0, 1], sizes = [4, 1], strides = [1, 1]} : vector<4x8xf32> to vector<4x1xf32>
    %20 = vector.shape_cast %19 : vector<4x1xf32> to vector<4x1xf32>
    %21 = vector.broadcast %20 : vector<4x1xf32> to vector<4x16xf32>
    %22 = vector.extract_strided_slice %2 {offsets = [0, 2], sizes = [4, 1], strides = [1, 1]} : vector<4x8xf32> to vector<4x1xf32>
    %23 = vector.shape_cast %22 : vector<4x1xf32> to vector<4x1xf32>
    %24 = vector.broadcast %23 : vector<4x1xf32> to vector<4x16xf32>
    %25 = vector.extract_strided_slice %2 {offsets = [0, 3], sizes = [4, 1], strides = [1, 1]} : vector<4x8xf32> to vector<4x1xf32>
    %26 = vector.shape_cast %25 : vector<4x1xf32> to vector<4x1xf32>
    %27 = vector.broadcast %26 : vector<4x1xf32> to vector<4x16xf32>
    %28 = vector.extract_strided_slice %2 {offsets = [0, 4], sizes = [4, 1], strides = [1, 1]} : vector<4x8xf32> to vector<4x1xf32>
    %29 = vector.shape_cast %28 : vector<4x1xf32> to vector<4x1xf32>
    %30 = vector.broadcast %29 : vector<4x1xf32> to vector<4x16xf32>
    %31 = vector.extract_strided_slice %2 {offsets = [0, 5], sizes = [4, 1], strides = [1, 1]} : vector<4x8xf32> to vector<4x1xf32>
    %32 = vector.shape_cast %31 : vector<4x1xf32> to vector<4x1xf32>
    %33 = vector.broadcast %32 : vector<4x1xf32> to vector<4x16xf32>
    %34 = vector.extract_strided_slice %2 {offsets = [0, 6], sizes = [4, 1], strides = [1, 1]} : vector<4x8xf32> to vector<4x1xf32>
    %35 = vector.shape_cast %34 : vector<4x1xf32> to vector<4x1xf32>
    %36 = vector.broadcast %35 : vector<4x1xf32> to vector<4x16xf32>
    %37 = vector.extract_strided_slice %2 {offsets = [0, 7], sizes = [4, 1], strides = [1, 1]} : vector<4x8xf32> to vector<4x1xf32>
    %38 = vector.shape_cast %37 : vector<4x1xf32> to vector<4x1xf32>
    %39 = vector.broadcast %38 : vector<4x1xf32> to vector<4x16xf32>
    %c0_7 = arith.constant 0 : index
    %c0_8 = arith.constant 0 : index
    %c0_9 = arith.constant 0 : index
    %40 = vector.load %arg2[%c0_7, %c0_8, %c0_9] : memref<1x4x16xf32, #tpu.memory_space<vmem>>, vector<1x4x16xf32>
    %41 = vector.shape_cast %40 : vector<1x4x16xf32> to vector<4x16xf32>
    %42 = vector.extract_strided_slice %41 {offsets = [0, 0], sizes = [1, 16], strides = [1, 1]} : vector<4x16xf32> to vector<1x16xf32>
    %43 = vector.broadcast %42 : vector<1x16xf32> to vector<8x16xf32>
    %44 = arith.mulf %6, %43 : vector<8x16xf32>
    %45 = vector.extract_strided_slice %41 {offsets = [1, 0], sizes = [1, 16], strides = [1, 1]} : vector<4x16xf32> to vector<1x16xf32>
    %46 = vector.broadcast %45 : vector<1x16xf32> to vector<8x16xf32>
    %47 = arith.mulf %9, %46 : vector<8x16xf32>
    %48 = arith.addf %44, %47 : vector<8x16xf32>
    %49 = vector.extract_strided_slice %41 {offsets = [2, 0], sizes = [1, 16], strides = [1, 1]} : vector<4x16xf32> to vector<1x16xf32>
    %50 = vector.broadcast %49 : vector<1x16xf32> to vector<8x16xf32>
    %51 = arith.mulf %12, %50 : vector<8x16xf32>
    %52 = arith.addf %48, %51 : vector<8x16xf32>
    %53 = vector.extract_strided_slice %41 {offsets = [3, 0], sizes = [1, 16], strides = [1, 1]} : vector<4x16xf32> to vector<1x16xf32>
    %54 = vector.broadcast %53 : vector<1x16xf32> to vector<8x16xf32>
    %55 = arith.mulf %15, %54 : vector<8x16xf32>
    %56 = arith.addf %52, %55 : vector<8x16xf32>
    %57 = vector.broadcast %1 : vector<8x1xf32> to vector<8x16xf32>
    %58 = arith.addf %56, %57 : vector<8x16xf32>
    %cst = arith.constant 0.000000e+00 : f32
    %59 = vector.broadcast %cst : f32 to vector<8x16xf32>
    %60 = arith.maximumf %58, %59 : vector<8x16xf32>
    %61 = vector.extract_strided_slice %60 {offsets = [0, 0], sizes = [1, 16], strides = [1, 1]} : vector<8x16xf32> to vector<1x16xf32>
    %62 = vector.broadcast %61 : vector<1x16xf32> to vector<4x16xf32>
    %63 = arith.mulf %18, %62 : vector<4x16xf32>
    %64 = vector.extract_strided_slice %60 {offsets = [1, 0], sizes = [1, 16], strides = [1, 1]} : vector<8x16xf32> to vector<1x16xf32>
    %65 = vector.broadcast %64 : vector<1x16xf32> to vector<4x16xf32>
    %66 = arith.mulf %21, %65 : vector<4x16xf32>
    %67 = arith.addf %63, %66 : vector<4x16xf32>
    %68 = vector.extract_strided_slice %60 {offsets = [2, 0], sizes = [1, 16], strides = [1, 1]} : vector<8x16xf32> to vector<1x16xf32>
    %69 = vector.broadcast %68 : vector<1x16xf32> to vector<4x16xf32>
    %70 = arith.mulf %24, %69 : vector<4x16xf32>
    %71 = arith.addf %67, %70 : vector<4x16xf32>
    %72 = vector.extract_strided_slice %60 {offsets = [3, 0], sizes = [1, 16], strides = [1, 1]} : vector<8x16xf32> to vector<1x16xf32>
    %73 = vector.broadcast %72 : vector<1x16xf32> to vector<4x16xf32>
    %74 = arith.mulf %27, %73 : vector<4x16xf32>
    %75 = arith.addf %71, %74 : vector<4x16xf32>
    %76 = vector.extract_strided_slice %60 {offsets = [4, 0], sizes = [1, 16], strides = [1, 1]} : vector<8x16xf32> to vector<1x16xf32>
    %77 = vector.broadcast %76 : vector<1x16xf32> to vector<4x16xf32>
    %78 = arith.mulf %30, %77 : vector<4x16xf32>
    %79 = arith.addf %75, %78 : vector<4x16xf32>
    %80 = vector.extract_strided_slice %60 {offsets = [5, 0], sizes = [1, 16], strides = [1, 1]} : vector<8x16xf32> to vector<1x16xf32>
    %81 = vector.broadcast %80 : vector<1x16xf32> to vector<4x16xf32>
    %82 = arith.mulf %33, %81 : vector<4x16xf32>
    %83 = arith.addf %79, %82 : vector<4x16xf32>
    %84 = vector.extract_strided_slice %60 {offsets = [6, 0], sizes = [1, 16], strides = [1, 1]} : vector<8x16xf32> to vector<1x16xf32>
    %85 = vector.broadcast %84 : vector<1x16xf32> to vector<4x16xf32>
    %86 = arith.mulf %36, %85 : vector<4x16xf32>
    %87 = arith.addf %83, %86 : vector<4x16xf32>
    %88 = vector.extract_strided_slice %60 {offsets = [7, 0], sizes = [1, 16], strides = [1, 1]} : vector<8x16xf32> to vector<1x16xf32>
    %89 = vector.broadcast %88 : vector<1x16xf32> to vector<4x16xf32>
    %90 = arith.mulf %39, %89 : vector<4x16xf32>
    %91 = arith.addf %87, %90 : vector<4x16xf32>
    %92 = vector.broadcast %3 : vector<4x1xf32> to vector<4x16xf32>
    %93 = arith.addf %91, %92 : vector<4x16xf32>
    %c0_10 = arith.constant 0 : index
    %c0_11 = arith.constant 0 : index
    %c0_12 = arith.constant 0 : index
    %94 = vector.load %arg7[%c0_10, %c0_11, %c0_12] : memref<1x4x16xf32, #tpu.memory_space<vmem>>, vector<1x4x16xf32>
    %95 = vector.shape_cast %94 : vector<1x4x16xf32> to vector<4x16xf32>
    %96 = vector.shape_cast %93 : vector<4x16xf32> to vector<1x4x16xf32>
    tpu.vector_store %arg7[%c0_10, %c0_11, %c0_12], %96 {strides = array<i32>} : memref<1x4x16xf32, #tpu.memory_space<vmem>>, vector<1x4x16xf32>,
    return
  }
  func.func @transform_0(%arg0: i32, %arg1: i32) -> (i32, i32, i32) {
    %c0_i32 = arith.constant 0 : i32
    %c0_i32_0 = arith.constant 0 : i32
    return %arg0, %c0_i32, %arg1 : i32, i32, i32
  }
  func.func @transform_1(%arg0: i32, %arg1: i32) -> (i32, i32) {
    %c0_i32 = arith.constant 0 : i32
    %c0_i32_0 = arith.constant 0 : i32
    %c0_i32_1 = arith.constant 0 : i32
    return %c0_i32, %c0_i32_0 : i32, i32
  }
  func.func @transform_2(%arg0: i32, %arg1: i32) -> (i32, i32) {
    %c0_i32 = arith.constant 0 : i32
    %c0_i32_0 = arith.constant 0 : i32
    %c0_i32_1 = arith.constant 0 : i32
    return %c0_i32, %c0_i32_0 : i32, i32
  }
  func.func @transform_3(%arg0: i32, %arg1: i32) -> (i32, i32) {
    %c0_i32 = arith.constant 0 : i32
    %c0_i32_0 = arith.constant 0 : i32
    %c0_i32_1 = arith.constant 0 : i32
    return %c0_i32, %c0_i32_0 : i32, i32
  }
  func.func @transform_4(%arg0: i32, %arg1: i32) -> (i32, i32) {
    %c0_i32 = arith.constant 0 : i32
    %c0_i32_0 = arith.constant 0 : i32
    %c0_i32_1 = arith.constant 0 : i32
    return %c0_i32, %c0_i32_0 : i32, i32
  }
  func.func @transform_5(%arg0: i32, %arg1: i32) -> (i32, i32, i32) {
    %c0_i32 = arith.constant 0 : i32
    %c0_i32_0 = arith.constant 0 : i32
    return %arg0, %c0_i32, %arg1 : i32, i32, i32
  }
}

</mosaic_0001>

<bundles_post_ra>
// kernel: tpu_custom_call.1
= control target key start
LH: loop header
LB: loop body
LE: loop exit
PB: predicated region body
PF: predicated region fallthrough
CT: control target
= control target key end

     0   :  { %10 = vsyncpa [#allocation3], 0  ;;  %s751_s0 = inlined_call_operand.vmem [shape: f32[2,4,16], index: 0, kind: input, shape index: {}]   ;;  %s752_s1 = inlined_call_operand.vmem [shape: f32[8,4], index: 1, kind: input, shape index: {}]   ;;  %s753_s2 = inlined_call_operand.vmem [shape: f32[8,1], index: 2, kind: input, shape index: {}]   ;;  %s754_s3 = inlined_call_operand.vmem [shape: f32[4,8], index: 3, kind: input, shape index: {}]   ;;  %s755_s4 = inlined_call_operand.vmem [shape: f32[4,1], index: 4, kind: input, shape index: {}]   ;;  %s756_s5 = inlined_call_operand.hbm [shape: f32[2,4,16], index: 5, kind: output, shape index: {}]  }
   0x1   :  { %12 = vsyncpa [#allocation3 + $0x1], 0  ;;  %s642_s18 = smov 0   ;;  %s644_s19 = smov 0  }
   0x2   :  { %s646_s20 = smov 0   ;;  %s648_s21 = smov 0  }
   0x3   :  { %s650_s22 = smov 0   ;;  %s652_s23 = smov 0  }
   0x4 LB: > { %s437_s24 = sadd.s32 4294967295, %s602_s23   ;;  %s438_s25 = sadd.s32 4294967294, %s602_s23   ;;  %s602_s23 = sphi %s652_s23, %s18_s23   ;;  %s598_s22 = sphi %s650_s22, %s763_s22   ;;  %s594_s21 = sphi %s648_s21, %s762_s21   ;;  %s590_s20 = sphi %s646_s20, %s761_s20   ;;  %s586_s19 = sphi %s644_s19, %s760_s19   ;;  %s582_s18 = sphi %s642_s18, %s759_s18  }
   0x5   : > { %s30_s26 = sadd.s32 1, %s598_s22  ;;  %s151_s27 = sadd.s32 1, %s590_s20 }
   0x6   : > { %p32_p0 = scmp.ge.s32.totalorder %s30_s26, 2  ;;  %p161_p1 = scmp.ne.s32.totalorder %s590_s20, %s586_s19 }
   0x7   : > { %p162_p2 = scmp.eq.s32.totalorder %s437_s24, 1  ;;  %p167_p3 = scmp.ne.s32.totalorder %s586_s19, %s582_s18 }
   0x8   : > { %s765_s26 = smov (%p32_p0, %s30_s26), 0  ;;  %p168_p5 = scmp.eq.s32.totalorder %s438_s25, 1 }
   0x9   : > { %p682_p4 = por %p162_p2, %p161_p1  ;;  %s146_s29 = ssub.s32 %s598_s22, %s765_s26 }
   0xa   : > { %p441_p6 = scmp.ge.s32.totalorder %s602_s23, 1  ;;  %p149_p7 = scmp.eq.s32.totalorder %s146_s29, 0 }
   0xb   : > { %p689_p8 = por %p168_p5, %p167_p3  ;;  %p208_p9 = scmp.lt.s32.totalorder %s602_s23, 3 }
   0xc   : > { %s695_s6 = scalar_select %p149_p7, %s590_s20, %s151_s27  }
   0xd   : > { %p209_p10 = pnand %p441_p6, %p208_p9 }
   0xe   : > { %p238_p11 = scmp.lt.s32.totalorder (!%p209_p10), %s594_s21, 1  ;;  %s235_s27 = sand.u32 (!%p209_p10), 1, %s586_s19  }
   0xf   : > { %212 = sbr.rel (%p209_p10) target bundleno = 184 (0xb8), region = 40  ;;  %s442_s29 = sshll.u32 (!%p209_p10), %s235_s27, 2 }
  0x10   : > { %s445_s7 = sshll.u32 (!%p209_p10), %s594_s21, 2  ;;  %s237_s11 = scalar_lea.vmem (!%p209_p10), [#allocation2], %s442_s29 }
  0x11   : > { %s361_s10 = scalar_lea.hbm (!%p209_p10), %s756_s5, %s445_s7  ;;  %s363_s12 = sshll.u32 (!%p209_p10), %s237_s11, 4  ;;  %s364_s12 = int_to_ptr.vmem [resolvable:$true] %s363_s12 }
  0x12   : > { %s365_s13 = sshll.u32 (!%p209_p10), %s361_s10, 4  ;;  %s544_s24 = scalar_lea.hbm (!%p209_p10), %s756_s5, 8  ;;  %s366_s13 = int_to_ptr.hbm [resolvable:$true] %s365_s13 }
  0x13   : > { %s538_s14 = sshra.s32 (!%p209_p10), %s366_s13, 4  ;;  %s539_s14 = int_to_ptr.hbm [resolvable:$true] %s538_s14 }
  0x14   : > { %v245_v0 = vld [vmem:[%s752_s1] sm:$0xff]  ;;  %v604_v1 = vmov 2   ;;  %v605_v2 = vmov 0   ;;  %v606_v4 = vmov 3   ;;  %v607_v5 = vmov 1   ;;  %s239_s15 = scalar_select %p238_p11, %s594_s21, 1 }
  0x15   : > { %513 = vset.pattern.permute.xlu1 %v604_v1  ;;  %511 = vset.pattern.permute.xlu0 %v605_v2  ;;  %v246_v3 = vld [vmem:[%s753_s2] sm:$0xff]  ;;  %v608_v8 = vmov 4   ;;  %v609_v9 = vmov 5   ;;  %v610_v10 = vmov 6   ;;  %v611_v11 = vmov 7   ;;  %s350_s21 = scalar_lea.sflag [#allocation3], %s235_s27  ;;  %p545_p1 = scmp.lt.s32.totalorder %s539_s14, %s756_s5 }
  0x16   : > { %259 = vperm.xlu1 %513, %v245_v0   ;;  %251 = vperm.xlu0 %511, %v245_v0   ;;  %v247_v6 = vld [vmem:[%s754_s3] sm:$0xf]  ;;  %s443_s16 = sshll.u32 %s239_s15, 2  ;;  %vm347_vm0 = vcmask 125952   ;;  %s540_s15 = scalar_lea.hbm %s539_s14, 4 }
  0x17   : > { %515 = vset.pattern.permute.xlu2 %v605_v2  ;;  %v248_v7 = vld [vmem:[%s755_s4] sm:$0xf]  ;;  %s244_s25 = scalar_lea.vmem %s751_s0, %s443_s16  ;;  %p541_p12 = scmp.ne.s32.totalorder %s539_s14, %s540_s15 }
  0x18   : > { %313 = vperm.xlu2 %515, %v246_v3   ;;  %v299_v15 = vld [vmem:[%s244_s25] sm:$0xf]  ;;  %p546_p2 = scmp.lt.s32.totalorder %s544_s24, %s540_s15 }
  0x19   : > { %v300_v17 = vperm.slane %v299_v15, 0  ;;  %v302_v18 = vperm.slane %v299_v15, 1  ;;  %v305_v19 = vperm.slane %v299_v15, 2  ;;  %v308_v23 = vperm.slane %v299_v15, 3  ;;  %p542_p13 = pnand %p541_p12, %p682_p4 }
  0x1a   : > { %p547_p3 = por %p546_p2, %p545_p1 }
  0x1b   : > { %p543_p0 = pneg %p542_p13 }
  0x1d   : > { %p548_p5 = pnand %p547_p3, %p543_p0 }
  0x1e   : > { %514 = vset.pattern.permute.xlu1 %v606_v4  ;;  %512 = vset.pattern.permute.xlu0 %v607_v5 }
  0x1f   : > { %263 = vperm.xlu1 %514, %v245_v0   ;;  %255 = vperm.xlu0 %512, %v245_v0  }
  0x20   : > { %268 = vperm.xlu2 %515, %v247_v6  }
  0x27   : > { %516 = vset.pattern.permute.xlu1 %v607_v5  ;;  %518 = vset.pattern.permute.xlu0 %v606_v4 }
  0x28   : > { %272 = vperm.xlu1 %516, %v247_v6   ;;  %280 = vperm.xlu0 %518, %v247_v6  }
  0x29   : > { %517 = vset.pattern.permute.xlu2 %v604_v1 }
  0x2a   : > { %276 = vperm.xlu2 %517, %v247_v6  }
  0x30   : > { %519 = vset.pattern.permute.xlu1 %v608_v8  ;;  %523 = vset.pattern.permute.xlu0 %v605_v2 }
  0x31   : > { %284 = vperm.xlu1 %519, %v247_v6   ;;  %343 = vperm.xlu0 %523, %v248_v7  }
  0x32   : > { %520 = vset.pattern.permute.xlu2 %v609_v9 }
  0x33   : > { %288 = vperm.xlu2 %520, %v247_v6  }
  0x39   : > { %521 = vset.pattern.permute.xlu1 %v610_v10 }
  0x3a   : > { %292 = vperm.xlu1 %521, %v247_v6  }
  0x3b   : > { %522 = vset.pattern.permute.xlu2 %v611_v11 }
  0x3c   : > { %296 = vperm.xlu2 %522, %v247_v6  }
  0x72   : > { %v314_v12 = vpop.permute.xlu2 %313 }
  0x7a   : > { %v269_v16 = vpop.permute.xlu2 %268 }
  0x84   : > { %v277_v29 = vpop.permute.xlu2 %276 }
  0x88   : > { %v260_v13 = vpop.permute.xlu1 %259  ;;  %v252_v14 = vpop.permute.xlu0 %251 }
  0x89   : > { %v301_v22 = vmul.f32 %v300_v17, %v252_v14  ;;  %v306_v25 = vmul.f32 %v305_v19, %v260_v13 }
  0x8d   : > { %v289_v41 = vpop.permute.xlu2 %288 }
  0x91   : > { %v264_v20 = vpop.permute.xlu1 %263  ;;  %v256_v21 = vpop.permute.xlu0 %255 }
  0x92   : > { %v303_v24 = vmul.f32 %v302_v18, %v256_v21  ;;  %v309_v27 = vmul.f32 %v308_v23, %v264_v20 }
  0x94   : > { %v304_v26 = vadd.f32 %v303_v24, %v301_v22 }
  0x96   : > { %v307_v28 = vadd.f32 %v306_v25, %v304_v26  ;;  %v297_v55 = vpop.permute.xlu2 %296 }
  0x98   : > { %v310_v30 = vadd.f32 %v309_v27, %v307_v28 }
  0x9a   : > { %v316_v31 = vadd.f32 %v314_v12, %v310_v30  ;;  %v273_v32 = vpop.permute.xlu1 %272  ;;  %v281_v40 = vpop.permute.xlu0 %280 }
  0x9c   : > { %v317_v33 = vmax.f32 %v316_v31, 0.0 }
  0x9e   : > { %v318_v34 = vperm.slane %v317_v33, 0  ;;  %v320_v35 = vperm.slane %v317_v33, 1  ;;  %v323_v36 = vperm.slane %v317_v33, 2  ;;  %v326_v39 = vperm.slane %v317_v33, 3 }
  0x9f   : > { %v329_v47 = vperm.slane %v317_v33, 4  ;;  %v332_v49 = vperm.slane %v317_v33, 5  ;;  %v338_v53 = vperm.slane %v317_v33, 7  ;;  %v335_v54 = vperm.slane %v317_v33, 6 }
  0xa0   : > { %v319_v37 = vmul.f32 %v318_v34, %v269_v16  ;;  %v321_v38 = vmul.f32 %v320_v35, %v273_v32  ;;  %v324_v43 = vmul.f32 %v323_v36, %v277_v29  ;;  %v327_v46 = vmul.f32 %v326_v39, %v281_v40 }
  0xa1   : > { %v333_v52 = vmul.f32 %v332_v49, %v289_v41  ;;  %v339_v59 = vmul.f32 %v338_v53, %v297_v55 }
  0xa2   : > { %v322_v42 = vadd.f32 %v321_v38, %v319_v37 }
  0xa3   : > { %v285_v44 = vpop.permute.xlu1 %284  ;;  %v344_v61 = vpop.permute.xlu0 %343 }
  0xa4   : > { %v325_v45 = vadd.f32 %v324_v43, %v322_v42  ;;  %v330_v50 = vmul.f32 %v329_v47, %v285_v44 }
  0xa6   : > { %v328_v48 = vadd.f32 %v327_v46, %v325_v45 }
  0xa8   : > { %v331_v51 = vadd.f32 %v330_v50, %v328_v48 }
  0xaa   : > { %v334_v57 = vadd.f32 %v333_v52, %v331_v51 }
  0xac   : > { %v293_v56 = vpop.permute.xlu1 %292 }
  0xad   : > { %v336_v58 = vmul.f32 %v335_v54, %v293_v56 }
  0xaf   : > { %v337_v60 = vadd.f32 %v336_v58, %v334_v57 }
  0xb1   : > { %v340_v62 = vadd.f32 %v339_v59, %v337_v60 }
  0xb3   : > { %v346_v63 = vadd.f32 %v344_v61, %v340_v62 }
  0xb5   : > { %348 = vst.msk [vmem:[%s237_s11] sm:$0xf] %vm347_vm0, %v346_v63 }
  0xb6   : > { %551 = shalt.err (!%p548_p5)
}
  0xb7   : > { %448 = dma.vmem_to_hbm [thread:$0]  (%p682_p4), %s364_s12, 64, %s366_s13, %s350_s21  }
  0xb8 PF: > { %p454_p6 = scmp.ge.s32.totalorder %s602_s23, 2  ;;  %s377_s27 = sand.u32 1, %s582_s18  }
  0xb9   : > { %s378_s7 = scalar_lea.sflag [#allocation3], %s377_s27 }
  0xba   : > { %p451_p7 = pnand %p454_p6, %p689_p8 }
  0xbc   : > { %p452_p9 = pneg %p451_p7 }
  0xbe   : > { %577 = dma.done.wait (%p452_p9), %s378_s7, 64  }
  0xbf   : > { %579 = vsyncadd (%p452_p9), %s378_s7, 4294967232  ;;  %s18_s23 = sadd.s32 1, %s602_s23   ;;  %s759_s18 = smov %s586_s19 }
  0xc0   : > { %p15_p10 = scmp.ge.s32.totalorder %s18_s23, 4   ;;  %s760_s19 = smov %s590_s20 }
  0xc1   : > { %s761_s20 = smov %s695_s6  ;;  %s762_s21 = smov %s598_s22 }
  0xc2   : > { %s763_s22 = smov %s765_s26  ;;  %17 = sbr.rel (!%p15_p10) target bundleno = 4 (0x4), region = 75 }
  0xc7   :  { %384 = vsyncpa [#allocation3], 1 }
  0xc8   :  { %386 = vsyncpa [#allocation3 + $0x1], 1 }

</bundles_post_ra>
